<compile_context>
chip_gen: v7x
topology: tpu7x:2x2x1
jax: 0.10.0
libtpu: 0.0.40
codegen_flags: <defaults>
</compile_context>

<pallas_src>
import functools

import jax
import jax.numpy as jnp
from jax.experimental import pallas as pl
from jax.experimental.pallas import tpu as pltpu

EMBEDDING_SIZE = 10
HIDDEN_SIZE = 8
INPUT_SIZE = 4      # vocab size
NUM_CLASS = 4
NUM_LAYERS = 2      # the two stacked layers are hard-fused in the kernel


def rnn_wavefront_kernel(ids_ref, tbl_first_ref, tbl_step_ref, w_comb_ref,
                         b_last_ref, fc_w_ref, fc_b_ref, out_ref, *,
                         seq_len, batch):
    """Wavefront-skewed 2-layer tanh RNN + deferred FC, single invocation.

    ids_ref      : SMEM (B*T,) int32, index b*T + t
    tbl_first_ref: VMEM (V, 1, 2H)  [emb@Wih0^T + b_ih0 + b_hh0 | 0]
    tbl_step_ref : VMEM (V, 1, 2H)  [emb@Wih0^T + b_ih0 + b_hh0 | b_ih1 + b_hh1]
    w_comb_ref   : VMEM (2H, 2H)    [[Whh0^T, Wih1^T], [0, Whh1^T]]
    b_last_ref   : VMEM (1, 2H)     [0 | b_ih1 + b_hh1]
    fc_w_ref     : VMEM (2H, C)     top H rows zero, bottom H rows = Wfc^T
    fc_b_ref     : VMEM (1, C)
    out_ref      : VMEM (B, T*C)    row-major identical to the (B*T, C) result
    """
    # Hoisted weight loads (vreg-resident across the whole unrolled chain).
    w_comb = w_comb_ref[...]
    b_last = b_last_ref[...]
    fc_w = fc_w_ref[...]
    fc_b = fc_b_ref[...]

    # Folded per-token input terms. These depend only on ids/tables, so every
    # gather sits off the serial carry chain and overlaps the recurrence.
    def gather(t, tbl_ref):
        rows = [tbl_ref[ids_ref[b * seq_len + t]] for b in range(batch)]  # (1, 2H)
        return jnp.concatenate(rows, axis=0)                              # (B, 2H)

    x_first = gather(0, tbl_first_ref)                                # [L(x_0) | 0]
    x_steps = [gather(t, tbl_step_ref) for t in range(1, seq_len)]    # [L(x_t) | b1]

    # Wavefront recurrence. Carry h = [h0_s, h1_{s-1}] (B, 2H).
    # Per serial step: ONE dot + ONE tanh.
    h = jnp.tanh(x_first)          # s = 0: [h0_0, 0]  (tanh(0)=0 keeps h1_{-1}=0)
    hist = []
    for s in range(1, seq_len):    # static unroll; T is tiny & static
        h = jnp.tanh(x_steps[s - 1]
                     + jnp.dot(h, w_comb, preferred_element_type=jnp.float32))
        hist.append(h)             # right half == h1_{s-1}
    # Epilogue (s = T): only the right half (h1_{T-1}) is meaningful.
    h = jnp.tanh(b_last + jnp.dot(h, w_comb, preferred_element_type=jnp.float32))
    hist.append(h)

    # TODO(synk): if T grows beyond ~32 the value-carried history will spill;
    # switch to lax.fori_loop(..., unroll=True) over chunks or reintroduce a VMEM
    # history scratch to bound live ranges.

    # Deferred FC, entirely in the epilogue, off the serial chain. fc_w's top H
    # rows are zero, so only the h1 halves of the history contribute (including
    # the garbage left half produced by the epilogue step).
    outs = [jnp.dot(hh, fc_w, preferred_element_type=jnp.float32) + fc_b
            for hh in hist]                                 # T x (B, C)
    out_ref[...] = jnp.concatenate(outs, axis=1)            # (B, T*C)


def prepare_params(params):
    """One-time, parameter-only folding into kernel-ready tensors."""
    H, V = HIDDEN_SIZE, INPUT_SIZE
    hp = jax.lax.Precision.HIGHEST

    # Embedding + layer-0 input projection + layer-0 biases folded into one table.
    left = (jnp.dot(params["emb"], params["w_ih0"].T, precision=hp)
            + params["b_ih0"] + params["b_hh0"])                       # (V, H)
    b1 = params["b_ih1"] + params["b_hh1"]                             # (H,)

    tbl_first = jnp.concatenate(
        [left, jnp.zeros((V, H), jnp.float32)], axis=1).reshape(V, 1, 2 * H)
    tbl_step = jnp.concatenate(
        [left, jnp.broadcast_to(b1, (V, H))], axis=1).reshape(V, 1, 2 * H)
    b_last = jnp.concatenate([jnp.zeros((H,), jnp.float32), b1]).reshape(1, 2 * H)

    # Combined upper-block-triangular recurrent/inter-layer matrix.
    w_comb = jnp.zeros((2 * H, 2 * H), jnp.float32)
    w_comb = w_comb.at[:H, :H].set(params["w_hh0"].T)
    w_comb = w_comb.at[:H, H:].set(params["w_ih1"].T)
    w_comb = w_comb.at[H:, H:].set(params["w_hh1"].T)

    # FC weight padded so it consumes the full (B, 2H) carry (h0 half hits zeros).
    fc_w_pad = jnp.zeros((2 * H, NUM_CLASS), jnp.float32).at[H:, :].set(params["fc_w"].T)
    fc_b_row = params["fc_b"].reshape(1, NUM_CLASS)

    return {"tbl_first": tbl_first, "tbl_step": tbl_step, "w_comb": w_comb,
            "b_last": b_last, "fc_w_pad": fc_w_pad, "fc_b_row": fc_b_row}


@jax.jit
def rnn_model_forward(x_ids, prep):
    """x_ids: (B, T) int32 token ids. Returns (B*T, NUM_CLASS) float32."""
    B, T = x_ids.shape
    H, C = HIDDEN_SIZE, NUM_CLASS
    ids_flat = x_ids.reshape(-1).astype(jnp.int32)          # index b*T + t

    kernel = functools.partial(rnn_wavefront_kernel, seq_len=T, batch=B)

    vmem = pl.BlockSpec(memory_space=pltpu.MemorySpace.VMEM)
    smem = pl.BlockSpec(memory_space=pltpu.MemorySpace.SMEM)

    flops = ((T + 1) * 2 * B * (2 * H) * (2 * H)            # wavefront recurrence
             + T * 2 * B * (2 * H) * C)                      # deferred FC
    transcendentals = (T + 1) * B * (2 * H)                  # one tanh per step
    bytes_accessed = 4 * (B * T                               # ids (int32)
                          + 2 * INPUT_SIZE * 2 * H            # tables
                          + (2 * H) ** 2 + 2 * H              # w_comb, b_last
                          + 2 * H * C + C                     # fc
                          + B * T * C)                        # output

    out = pl.pallas_call(
        kernel,
        out_shape=jax.ShapeDtypeStruct((B, T * C), jnp.float32),
        in_specs=[smem, vmem, vmem, vmem, vmem, vmem, vmem],
        out_specs=vmem,
        cost_estimate=pl.CostEstimate(flops=flops,
                                      transcendentals=transcendentals,
                                      bytes_accessed=bytes_accessed),
    )(ids_flat, prep["tbl_first"], prep["tbl_step"], prep["w_comb"],
      prep["b_last"], prep["fc_w_pad"], prep["fc_b_row"])    # (B, T*C)

    # TODO(synk): at non-toy batch sizes add a grid over B (BlockSpec on the batch
    # axis, dimension_semantics=("parallel",)) so v7x's second TensorCore is used,
    # re-deriving tile/history sizes against 64 MiB VMEM per TC; on v7x the carry
    # dot could also use explicit matmul_push_rhs/acc/pop into the MRB, and on v5e
    # a VPU broadcast-FMA formulation may undercut the MXU->MRF latency.

    # Row-major (B, T*C) is bit-identical to (B*T, C) in b*T+t order -> free reshape.
    return out.reshape(B * T, C)


def init_params(key):
    """Deterministic parameters matching the PyTorch module's shapes."""
    ks = jax.random.split(key, 12)
    k = 1.0 / jnp.sqrt(HIDDEN_SIZE)
    u = lambda kk, shape: jax.random.uniform(kk, shape, jnp.float32, -k, k)
    return {
        "emb":   jax.random.normal(ks[0], (INPUT_SIZE, EMBEDDING_SIZE), jnp.float32),
        # RNN layer 0
        "w_ih0": u(ks[1], (HIDDEN_SIZE, EMBEDDING_SIZE)),
        "w_hh0": u(ks[2], (HIDDEN_SIZE, HIDDEN_SIZE)),
        "b_ih0": u(ks[3], (HIDDEN_SIZE,)),
        "b_hh0": u(ks[4], (HIDDEN_SIZE,)),
        # RNN layer 1
        "w_ih1": u(ks[5], (HIDDEN_SIZE, HIDDEN_SIZE)),
        "w_hh1": u(ks[6], (HIDDEN_SIZE, HIDDEN_SIZE)),
        "b_ih1": u(ks[7], (HIDDEN_SIZE,)),
        "b_hh1": u(ks[8], (HIDDEN_SIZE,)),
        # FC
        "fc_w":  u(ks[9], (NUM_CLASS, HIDDEN_SIZE)),
        "fc_b":  u(ks[10], (NUM_CLASS,)),
    }


def reference_forward(x_ids, params):
    """Pure-JAX reference mirroring the torch semantics."""
    B, T = x_ids.shape
    x = params["emb"][x_ids]                                           # (B, T, E)
    h0 = jnp.zeros((B, HIDDEN_SIZE), jnp.float32)
    h1 = jnp.zeros((B, HIDDEN_SIZE), jnp.float32)
    outs = []
    for t in range(T):
        xt = x[:, t, :]
        h0 = jnp.tanh(xt @ params["w_ih0"].T + params["b_ih0"]
                      + h0 @ params["w_hh0"].T + params["b_hh0"])
        h1 = jnp.tanh(h0 @ params["w_ih1"].T + params["b_ih1"]
                      + h1 @ params["w_hh1"].T + params["b_hh1"])
        outs.append(h1)
    y = jnp.stack(outs, axis=1)                                        # (B, T, H)
    y = y @ params["fc_w"].T + params["fc_b"]                          # (B, T, C)
    return y.reshape(-1, NUM_CLASS)


if __name__ == "__main__":
    key = jax.random.PRNGKey(0)
    k_param, k_data = jax.random.split(key)

    params = init_params(k_param)
    prepared = prepare_params(params)          # parameter-only folding, done once

    batch, seq = 2, 8
    x_ids = jax.random.randint(k_data, (batch, seq), 0, INPUT_SIZE, dtype=jnp.int32)

    out = jax.block_until_ready(rnn_model_forward(x_ids, prepared))
    ref = reference_forward(x_ids, params)

    assert out.shape == (batch * seq, NUM_CLASS)
    assert jnp.allclose(out, ref, atol=1e-4, rtol=1e-4), (
        "max abs err = %e" % float(jnp.max(jnp.abs(out - ref))))

    print("KERNEL_OK")
</pallas_src>

<mosaic_0001>
module attributes {stable_mosaic.version = 11 : i64} {
  func.func @rnn_wavefront_kernel(%arg0: memref<16xi32, #tpu.memory_space<smem>>, %arg1: memref<4x1x16xf32, #tpu.memory_space<vmem>>, %arg2: memref<4x1x16xf32, #tpu.memory_space<vmem>>, %arg3: memref<16x16xf32, #tpu.memory_space<vmem>>, %arg4: memref<1x16xf32, #tpu.memory_space<vmem>>, %arg5: memref<16x4xf32, #tpu.memory_space<vmem>>, %arg6: memref<1x4xf32, #tpu.memory_space<vmem>>, %arg7: memref<2x32xf32, #tpu.memory_space<vmem>>) attributes {dimension_semantics = [], scalar_prefetch = 0 : i64, scratch_operands = 0 : i64, tpu.core_type = #tpu.core_type<tc>} {
    %c0 = arith.constant 0 : index
    %c0_0 = arith.constant 0 : index
    %0 = vector.load %arg3[%c0, %c0_0] : memref<16x16xf32, #tpu.memory_space<vmem>>, vector<16x16xf32>
    %c0_1 = arith.constant 0 : index
    %c0_2 = arith.constant 0 : index
    %1 = vector.load %arg4[%c0_1, %c0_2] : memref<1x16xf32, #tpu.memory_space<vmem>>, vector<1x16xf32>
    %c0_3 = arith.constant 0 : index
    %c0_4 = arith.constant 0 : index
    %2 = vector.load %arg5[%c0_3, %c0_4] : memref<16x4xf32, #tpu.memory_space<vmem>>, vector<16x4xf32>
    %c0_5 = arith.constant 0 : index
    %c0_6 = arith.constant 0 : index
    %3 = vector.load %arg6[%c0_5, %c0_6] : memref<1x4xf32, #tpu.memory_space<vmem>>, vector<1x4xf32>
    %c0_7 = arith.constant 0 : index
    %4 = memref.load %arg0[%c0_7] : memref<16xi32, #tpu.memory_space<smem>>
    %5 = arith.index_cast %4 : i32 to index
    %c0_8 = arith.constant 0 : index
    %c0_9 = arith.constant 0 : index
    %6 = vector.load %arg1[%5, %c0_8, %c0_9] : memref<4x1x16xf32, #tpu.memory_space<vmem>>, vector<1x1x16xf32>
    %7 = vector.shape_cast %6 : vector<1x1x16xf32> to vector<1x16xf32>
    %c8 = arith.constant 8 : index
    %8 = memref.load %arg0[%c8] : memref<16xi32, #tpu.memory_space<smem>>
    %9 = arith.index_cast %8 : i32 to index
    %c0_10 = arith.constant 0 : index
    %c0_11 = arith.constant 0 : index
    %10 = vector.load %arg1[%9, %c0_10, %c0_11] : memref<4x1x16xf32, #tpu.memory_space<vmem>>, vector<1x1x16xf32>
    %11 = vector.shape_cast %10 : vector<1x1x16xf32> to vector<1x16xf32>
    %12 = tpu.concatenate %7, %11 in 0 : vector<1x16xf32>, vector<1x16xf32> -> vector<2x16xf32>
    %c1 = arith.constant 1 : index
    %13 = memref.load %arg0[%c1] : memref<16xi32, #tpu.memory_space<smem>>
    %14 = arith.index_cast %13 : i32 to index
    %c0_12 = arith.constant 0 : index
    %c0_13 = arith.constant 0 : index
    %15 = vector.load %arg2[%14, %c0_12, %c0_13] : memref<4x1x16xf32, #tpu.memory_space<vmem>>, vector<1x1x16xf32>
    %16 = vector.shape_cast %15 : vector<1x1x16xf32> to vector<1x16xf32>
    %c9 = arith.constant 9 : index
    %17 = memref.load %arg0[%c9] : memref<16xi32, #tpu.memory_space<smem>>
    %18 = arith.index_cast %17 : i32 to index
    %c0_14 = arith.constant 0 : index
    %c0_15 = arith.constant 0 : index
    %19 = vector.load %arg2[%18, %c0_14, %c0_15] : memref<4x1x16xf32, #tpu.memory_space<vmem>>, vector<1x1x16xf32>
    %20 = vector.shape_cast %19 : vector<1x1x16xf32> to vector<1x16xf32>
    %21 = tpu.concatenate %16, %20 in 0 : vector<1x16xf32>, vector<1x16xf32> -> vector<2x16xf32>
    %c2 = arith.constant 2 : index
    %22 = memref.load %arg0[%c2] : memref<16xi32, #tpu.memory_space<smem>>
    %23 = arith.index_cast %22 : i32 to index
    %c0_16 = arith.constant 0 : index
    %c0_17 = arith.constant 0 : index
    %24 = vector.load %arg2[%23, %c0_16, %c0_17] : memref<4x1x16xf32, #tpu.memory_space<vmem>>, vector<1x1x16xf32>
    %25 = vector.shape_cast %24 : vector<1x1x16xf32> to vector<1x16xf32>
    %c10 = arith.constant 10 : index
    %26 = memref.load %arg0[%c10] : memref<16xi32, #tpu.memory_space<smem>>
    %27 = arith.index_cast %26 : i32 to index
    %c0_18 = arith.constant 0 : index
    %c0_19 = arith.constant 0 : index
    %28 = vector.load %arg2[%27, %c0_18, %c0_19] : memref<4x1x16xf32, #tpu.memory_space<vmem>>, vector<1x1x16xf32>
    %29 = vector.shape_cast %28 : vector<1x1x16xf32> to vector<1x16xf32>
    %30 = tpu.concatenate %25, %29 in 0 : vector<1x16xf32>, vector<1x16xf32> -> vector<2x16xf32>
    %c3 = arith.constant 3 : index
    %31 = memref.load %arg0[%c3] : memref<16xi32, #tpu.memory_space<smem>>
    %32 = arith.index_cast %31 : i32 to index
    %c0_20 = arith.constant 0 : index
    %c0_21 = arith.constant 0 : index
    %33 = vector.load %arg2[%32, %c0_20, %c0_21] : memref<4x1x16xf32, #tpu.memory_space<vmem>>, vector<1x1x16xf32>
    %34 = vector.shape_cast %33 : vector<1x1x16xf32> to vector<1x16xf32>
    %c11 = arith.constant 11 : index
    %35 = memref.load %arg0[%c11] : memref<16xi32, #tpu.memory_space<smem>>
    %36 = arith.index_cast %35 : i32 to index
    %c0_22 = arith.constant 0 : index
    %c0_23 = arith.constant 0 : index
    %37 = vector.load %arg2[%36, %c0_22, %c0_23] : memref<4x1x16xf32, #tpu.memory_space<vmem>>, vector<1x1x16xf32>
    %38 = vector.shape_cast %37 : vector<1x1x16xf32> to vector<1x16xf32>
    %39 = tpu.concatenate %34, %38 in 0 : vector<1x16xf32>, vector<1x16xf32> -> vector<2x16xf32>
    %c4 = arith.constant 4 : index
    %40 = memref.load %arg0[%c4] : memref<16xi32, #tpu.memory_space<smem>>
    %41 = arith.index_cast %40 : i32 to index
    %c0_24 = arith.constant 0 : index
    %c0_25 = arith.constant 0 : index
    %42 = vector.load %arg2[%41, %c0_24, %c0_25] : memref<4x1x16xf32, #tpu.memory_space<vmem>>, vector<1x1x16xf32>
    %43 = vector.shape_cast %42 : vector<1x1x16xf32> to vector<1x16xf32>
    %c12 = arith.constant 12 : index
    %44 = memref.load %arg0[%c12] : memref<16xi32, #tpu.memory_space<smem>>
    %45 = arith.index_cast %44 : i32 to index
    %c0_26 = arith.constant 0 : index
    %c0_27 = arith.constant 0 : index
    %46 = vector.load %arg2[%45, %c0_26, %c0_27] : memref<4x1x16xf32, #tpu.memory_space<vmem>>, vector<1x1x16xf32>
    %47 = vector.shape_cast %46 : vector<1x1x16xf32> to vector<1x16xf32>
    %48 = tpu.concatenate %43, %47 in 0 : vector<1x16xf32>, vector<1x16xf32> -> vector<2x16xf32>
    %c5 = arith.constant 5 : index
    %49 = memref.load %arg0[%c5] : memref<16xi32, #tpu.memory_space<smem>>
    %50 = arith.index_cast %49 : i32 to index
    %c0_28 = arith.constant 0 : index
    %c0_29 = arith.constant 0 : index
    %51 = vector.load %arg2[%50, %c0_28, %c0_29] : memref<4x1x16xf32, #tpu.memory_space<vmem>>, vector<1x1x16xf32>
    %52 = vector.shape_cast %51 : vector<1x1x16xf32> to vector<1x16xf32>
    %c13 = arith.constant 13 : index
    %53 = memref.load %arg0[%c13] : memref<16xi32, #tpu.memory_space<smem>>
    %54 = arith.index_cast %53 : i32 to index
    %c0_30 = arith.constant 0 : index
    %c0_31 = arith.constant 0 : index
    %55 = vector.load %arg2[%54, %c0_30, %c0_31] : memref<4x1x16xf32, #tpu.memory_space<vmem>>, vector<1x1x16xf32>
    %56 = vector.shape_cast %55 : vector<1x1x16xf32> to vector<1x16xf32>
    %57 = tpu.concatenate %52, %56 in 0 : vector<1x16xf32>, vector<1x16xf32> -> vector<2x16xf32>
    %c6 = arith.constant 6 : index
    %58 = memref.load %arg0[%c6] : memref<16xi32, #tpu.memory_space<smem>>
    %59 = arith.index_cast %58 : i32 to index
    %c0_32 = arith.constant 0 : index
    %c0_33 = arith.constant 0 : index
    %60 = vector.load %arg2[%59, %c0_32, %c0_33] : memref<4x1x16xf32, #tpu.memory_space<vmem>>, vector<1x1x16xf32>
    %61 = vector.shape_cast %60 : vector<1x1x16xf32> to vector<1x16xf32>
    %c14 = arith.constant 14 : index
    %62 = memref.load %arg0[%c14] : memref<16xi32, #tpu.memory_space<smem>>
    %63 = arith.index_cast %62 : i32 to index
    %c0_34 = arith.constant 0 : index
    %c0_35 = arith.constant 0 : index
    %64 = vector.load %arg2[%63, %c0_34, %c0_35] : memref<4x1x16xf32, #tpu.memory_space<vmem>>, vector<1x1x16xf32>
    %65 = vector.shape_cast %64 : vector<1x1x16xf32> to vector<1x16xf32>
    %66 = tpu.concatenate %61, %65 in 0 : vector<1x16xf32>, vector<1x16xf32> -> vector<2x16xf32>
    %c7 = arith.constant 7 : index
    %67 = memref.load %arg0[%c7] : memref<16xi32, #tpu.memory_space<smem>>
    %68 = arith.index_cast %67 : i32 to index
    %c0_36 = arith.constant 0 : index
    %c0_37 = arith.constant 0 : index
    %69 = vector.load %arg2[%68, %c0_36, %c0_37] : memref<4x1x16xf32, #tpu.memory_space<vmem>>, vector<1x1x16xf32>
    %70 = vector.shape_cast %69 : vector<1x1x16xf32> to vector<1x16xf32>
    %c15 = arith.constant 15 : index
    %71 = memref.load %arg0[%c15] : memref<16xi32, #tpu.memory_space<smem>>
    %72 = arith.index_cast %71 : i32 to index
    %c0_38 = arith.constant 0 : index
    %c0_39 = arith.constant 0 : index
    %73 = vector.load %arg2[%72, %c0_38, %c0_39] : memref<4x1x16xf32, #tpu.memory_space<vmem>>, vector<1x1x16xf32>
    %74 = vector.shape_cast %73 : vector<1x1x16xf32> to vector<1x16xf32>
    %75 = tpu.concatenate %70, %74 in 0 : vector<1x16xf32>, vector<1x16xf32> -> vector<2x16xf32>
    %76 = math.tanh %12 : vector<2x16xf32>
    %cst = arith.constant dense<0.000000e+00> : vector<2x16xf32>
    %77 = tpu.matmul %76, %0, %cst {dimension_numbers = #tpu.dot_dimension_numbers<[1], [0], [0], [1], [0, 0, 1, 1], [], []>} : vector<2x16xf32>, vector<16x16xf32>, vector<2x16xf32> -> vector<2x16xf32>
    %78 = arith.addf %21, %77 : vector<2x16xf32>
    %79 = math.tanh %78 : vector<2x16xf32>
    %cst_40 = arith.constant dense<0.000000e+00> : vector<2x16xf32>
    %80 = tpu.matmul %79, %0, %cst_40 {dimension_numbers = #tpu.dot_dimension_numbers<[1], [0], [0], [1], [0, 0, 1, 1], [], []>} : vector<2x16xf32>, vector<16x16xf32>, vector<2x16xf32> -> vector<2x16xf32>
    %81 = arith.addf %30, %80 : vector<2x16xf32>
    %82 = math.tanh %81 : vector<2x16xf32>
    %cst_41 = arith.constant dense<0.000000e+00> : vector<2x16xf32>
    %83 = tpu.matmul %82, %0, %cst_41 {dimension_numbers = #tpu.dot_dimension_numbers<[1], [0], [0], [1], [0, 0, 1, 1], [], []>} : vector<2x16xf32>, vector<16x16xf32>, vector<2x16xf32> -> vector<2x16xf32>
    %84 = arith.addf %39, %83 : vector<2x16xf32>
    %85 = math.tanh %84 : vector<2x16xf32>
    %cst_42 = arith.constant dense<0.000000e+00> : vector<2x16xf32>
    %86 = tpu.matmul %85, %0, %cst_42 {dimension_numbers = #tpu.dot_dimension_numbers<[1], [0], [0], [1], [0, 0, 1, 1], [], []>} : vector<2x16xf32>, vector<16x16xf32>, vector<2x16xf32> -> vector<2x16xf32>
    %87 = arith.addf %48, %86 : vector<2x16xf32>
    %88 = math.tanh %87 : vector<2x16xf32>
    %cst_43 = arith.constant dense<0.000000e+00> : vector<2x16xf32>
    %89 = tpu.matmul %88, %0, %cst_43 {dimension_numbers = #tpu.dot_dimension_numbers<[1], [0], [0], [1], [0, 0, 1, 1], [], []>} : vector<2x16xf32>, vector<16x16xf32>, vector<2x16xf32> -> vector<2x16xf32>
    %90 = arith.addf %57, %89 : vector<2x16xf32>
    %91 = math.tanh %90 : vector<2x16xf32>
    %cst_44 = arith.constant dense<0.000000e+00> : vector<2x16xf32>
    %92 = tpu.matmul %91, %0, %cst_44 {dimension_numbers = #tpu.dot_dimension_numbers<[1], [0], [0], [1], [0, 0, 1, 1], [], []>} : vector<2x16xf32>, vector<16x16xf32>, vector<2x16xf32> -> vector<2x16xf32>
    %93 = arith.addf %66, %92 : vector<2x16xf32>
    %94 = math.tanh %93 : vector<2x16xf32>
    %cst_45 = arith.constant dense<0.000000e+00> : vector<2x16xf32>
    %95 = tpu.matmul %94, %0, %cst_45 {dimension_numbers = #tpu.dot_dimension_numbers<[1], [0], [0], [1], [0, 0, 1, 1], [], []>} : vector<2x16xf32>, vector<16x16xf32>, vector<2x16xf32> -> vector<2x16xf32>
    %96 = arith.addf %75, %95 : vector<2x16xf32>
    %97 = math.tanh %96 : vector<2x16xf32>
    %cst_46 = arith.constant dense<0.000000e+00> : vector<2x16xf32>
    %98 = tpu.matmul %97, %0, %cst_46 {dimension_numbers = #tpu.dot_dimension_numbers<[1], [0], [0], [1], [0, 0, 1, 1], [], []>} : vector<2x16xf32>, vector<16x16xf32>, vector<2x16xf32> -> vector<2x16xf32>
    %99 = vector.broadcast %1 : vector<1x16xf32> to vector<2x16xf32>
    %100 = arith.addf %99, %98 : vector<2x16xf32>
    %101 = math.tanh %100 : vector<2x16xf32>
    %cst_47 = arith.constant dense<0.000000e+00> : vector<2x4xf32>
    %102 = tpu.matmul %79, %2, %cst_47 {dimension_numbers = #tpu.dot_dimension_numbers<[1], [0], [0], [1], [0, 0, 1, 1], [], []>} : vector<2x16xf32>, vector<16x4xf32>, vector<2x4xf32> -> vector<2x4xf32>
    %103 = vector.broadcast %3 : vector<1x4xf32> to vector<2x4xf32>
    %104 = arith.addf %102, %103 : vector<2x4xf32>
    %cst_48 = arith.constant dense<0.000000e+00> : vector<2x4xf32>
    %105 = tpu.matmul %82, %2, %cst_48 {dimension_numbers = #tpu.dot_dimension_numbers<[1], [0], [0], [1], [0, 0, 1, 1], [], []>} : vector<2x16xf32>, vector<16x4xf32>, vector<2x4xf32> -> vector<2x4xf32>
    %106 = vector.broadcast %3 : vector<1x4xf32> to vector<2x4xf32>
    %107 = arith.addf %105, %106 : vector<2x4xf32>
    %cst_49 = arith.constant dense<0.000000e+00> : vector<2x4xf32>
    %108 = tpu.matmul %85, %2, %cst_49 {dimension_numbers = #tpu.dot_dimension_numbers<[1], [0], [0], [1], [0, 0, 1, 1], [], []>} : vector<2x16xf32>, vector<16x4xf32>, vector<2x4xf32> -> vector<2x4xf32>
    %109 = vector.broadcast %3 : vector<1x4xf32> to vector<2x4xf32>
    %110 = arith.addf %108, %109 : vector<2x4xf32>
    %cst_50 = arith.constant dense<0.000000e+00> : vector<2x4xf32>
    %111 = tpu.matmul %88, %2, %cst_50 {dimension_numbers = #tpu.dot_dimension_numbers<[1], [0], [0], [1], [0, 0, 1, 1], [], []>} : vector<2x16xf32>, vector<16x4xf32>, vector<2x4xf32> -> vector<2x4xf32>
    %112 = vector.broadcast %3 : vector<1x4xf32> to vector<2x4xf32>
    %113 = arith.addf %111, %112 : vector<2x4xf32>
    %cst_51 = arith.constant dense<0.000000e+00> : vector<2x4xf32>
    %114 = tpu.matmul %91, %2, %cst_51 {dimension_numbers = #tpu.dot_dimension_numbers<[1], [0], [0], [1], [0, 0, 1, 1], [], []>} : vector<2x16xf32>, vector<16x4xf32>, vector<2x4xf32> -> vector<2x4xf32>
    %115 = vector.broadcast %3 : vector<1x4xf32> to vector<2x4xf32>
    %116 = arith.addf %114, %115 : vector<2x4xf32>
    %cst_52 = arith.constant dense<0.000000e+00> : vector<2x4xf32>
    %117 = tpu.matmul %94, %2, %cst_52 {dimension_numbers = #tpu.dot_dimension_numbers<[1], [0], [0], [1], [0, 0, 1, 1], [], []>} : vector<2x16xf32>, vector<16x4xf32>, vector<2x4xf32> -> vector<2x4xf32>
    %118 = vector.broadcast %3 : vector<1x4xf32> to vector<2x4xf32>
    %119 = arith.addf %117, %118 : vector<2x4xf32>
    %cst_53 = arith.constant dense<0.000000e+00> : vector<2x4xf32>
    %120 = tpu.matmul %97, %2, %cst_53 {dimension_numbers = #tpu.dot_dimension_numbers<[1], [0], [0], [1], [0, 0, 1, 1], [], []>} : vector<2x16xf32>, vector<16x4xf32>, vector<2x4xf32> -> vector<2x4xf32>
    %121 = vector.broadcast %3 : vector<1x4xf32> to vector<2x4xf32>
    %122 = arith.addf %120, %121 : vector<2x4xf32>
    %cst_54 = arith.constant dense<0.000000e+00> : vector<2x4xf32>
    %123 = tpu.matmul %101, %2, %cst_54 {dimension_numbers = #tpu.dot_dimension_numbers<[1], [0], [0], [1], [0, 0, 1, 1], [], []>} : vector<2x16xf32>, vector<16x4xf32>, vector<2x4xf32> -> vector<2x4xf32>
    %124 = vector.broadcast %3 : vector<1x4xf32> to vector<2x4xf32>
    %125 = arith.addf %123, %124 : vector<2x4xf32>
    %126 = tpu.concatenate %104, %107, %110, %113, %116, %119, %122, %125 in 1 : vector<2x4xf32>, vector<2x4xf32>, vector<2x4xf32>, vector<2x4xf32>, vector<2x4xf32>, vector<2x4xf32>, vector<2x4xf32>, vector<2x4xf32> -> vector<2x32xf32>
    %c0_55 = arith.constant 0 : index
    %c0_56 = arith.constant 0 : index
    %127 = vector.load %arg7[%c0_55, %c0_56] : memref<2x32xf32, #tpu.memory_space<vmem>>, vector<2x32xf32>
    tpu.vector_store %arg7[%c0_55, %c0_56], %126 {strides = array<i32>} : memref<2x32xf32, #tpu.memory_space<vmem>>, vector<2x32xf32>,
    return
  }
}

</mosaic_0001>

<bundles_post_ra>
// kernel: rnn_model_forward.1
= control target key start
LH: loop header
LB: loop body
LE: loop exit
PB: predicated region body
PF: predicated region fallthrough
CT: control target
= control target key end

     0   :  { %12 = vsyncpa [#allocation3], 0  ;;  %s1914_s0 = inlined_call_operand.vmem [shape: s32[16], index: 0, kind: input, shape index: {}]   ;;  %s1915_s1 = inlined_call_operand.vmem [shape: f32[4,1,16], index: 1, kind: input, shape index: {}]   ;;  %s1916_s2 = inlined_call_operand.vmem [shape: f32[4,1,16], index: 2, kind: input, shape index: {}]   ;;  %s1917_s3 = inlined_call_operand.vmem [shape: f32[16,16], index: 3, kind: input, shape index: {}]   ;;  %s1918_s4 = inlined_call_operand.vmem [shape: f32[1,16], index: 4, kind: input, shape index: {}]   ;;  %s1919_s5 = inlined_call_operand.vmem [shape: f32[16,4], index: 5, kind: input, shape index: {}]   ;;  %s1920_s6 = inlined_call_operand.vmem [shape: f32[1,4], index: 6, kind: input, shape index: {}]   ;;  %s1921_s7 = inlined_call_operand.vmem [shape: f32[2,32], index: 7, kind: output, shape index: {}]  }
   0x1   :  { %s19_s26 = sshll.u32 %s1914_s0, 4  ;;  %s20_s26 = int_to_ptr.vmem [resolvable:$true] %s19_s26 }
   0x2   :  { %s1669_s27 = scalar_lea.vmem %s20_s26, 16  ;;  %p1674_p1 = scmp.lt.s32.totalorder %s20_s26, %s20_s26 }
   0x3   :  { %p1670_p0 = scmp.ne.s32.totalorder %s20_s26, %s1669_s27  ;;  %p1675_p2 = scmp.lt.s32.totalorder %s1669_s27, %s1669_s27 }
   0x5   :  { %p1676_p3 = por %p1675_p2, %p1674_p1 }
   0x7   :  { %p1677_p4 = pnand %p1676_p3, %p1670_p0 }
   0x9   :  { %1680 = shalt.err (!%p1677_p4)
}
   0xa   :  { %s1683_s28 = smov [#allocation2]  }
   0xb   :  { %22 = dma.vmem_to_smem %s20_s26, 16, %s1683_s28, [#allocation3]  }
   0xc   :  { %1681 = dma.done.wait [#allocation3], 16  }
   0xd   :  { %1682 = vsyncadd [#allocation3], 4294967280 }
   0xe   :  { %38 = sfence }
   0xf   :  { %v39_v0 = vld [vmem:[%s1917_s3] sm:$0xff]  ;;  %v40_v1 = vld [vmem:[%s1917_s3 + $0x8] sm:$0xff]  ;;  %v1684_v2 = vmov 0.0|0.0   ;;  %vm1685_vm0 = vmmov 0   ;;  %v1686_v4 = vmov 0.0   ;;  %s45_s0 = sld [smem:[#allocation2]] }
  0x10   :  { %1592 = vmatprep.subr.bf16.mxu0 %v1684_v2  ;;  %v1744_v3 = vpack.c.bf16 %v40_v1, %v39_v0  ;;  %1484 = vmatprep.mubr.msk.f32.mxu0 %vm1685_vm0, %v1686_v4  ;;  %s1391_s10 = sld [smem:[#allocation2 + $0x8]]  ;;  %vm57_vm1 = vcmask 1040384   ;;  %vm151_vm2 = vcmask 130048   ;;  %s1393_s16 = sld [smem:[#allocation2 + $0x1]]  ;;  %v42_v50 = vld [vmem:[%s1919_s5] sm:$0xff]  ;;  %v43_v51 = vld [vmem:[%s1919_s5 + $0x8] sm:$0xff] }
  0x11   :  { %1595 = vmatprep.subr.bf16.mxu1 %v1684_v2  ;;  %1491 = vmatprep.mubr.msk.f32.mxu1 %vm1685_vm0, %v1686_v4  ;;  %s1394_s17 = sld [smem:[#allocation2 + $0x9]]  ;;  %s1396_s23 = sld [smem:[#allocation2 + $0x2]]  ;;  %v1617_v52 = vpack.c.bf16 %v43_v51, %v42_v50  ;;  %v1877_v62 = vld [vmem:[%s1920_s6] ss:$0 sm:$0xff]  ;;  %vm1355_vm3 = vcmask 31744   ;;  %vm1357_vm4 = vcmask 64512  }
  0x12   :  { %1594 = vmatpush3.bf16.msra.mxu0 %v1744_v3  ;;  %1597 = vmatpush3.bf16.msra.mxu1 %v1744_v3  ;;  %s1397_s24 = sld [smem:[#allocation2 + $0xa]]  ;;  %s1399_s8 = sld [smem:[#allocation2 + $0x3]]  ;;  %vm1359_vm5 = vcmask 97280   ;;  %vm1362_vm6 = vcmask 162816   ;;  %vm1364_vm7 = vcmask 195584   ;;  %vm1366_vm8 = vcmask 228352  }
  0x13   :  { %1598 = vmatprep.subr.bf16.mxu0 %v1684_v2  ;;  %1601 = vmatprep.subr.bf16.mxu1 %v1684_v2  ;;  %s1400_s9 = sld [smem:[#allocation2 + $0xb]]  ;;  %s1402_s14 = sld [smem:[#allocation2 + $0x4]]  ;;  %vm1368_vm9 = vcmask 254976  }
  0x14   :  { %s1405_s21 = sld [smem:[#allocation2 + $0x5]]  ;;  %s1408_s29 = sld [smem:[#allocation2 + $0x6]] }
  0x15   :  { %s46_s12 = scalar_lea.vmem %s1915_s1, %s45_s0  ;;  %s1411_s5 = sld [smem:[#allocation2 + $0x7]] }
  0x16   :  { %s49_s15 = scalar_lea.vmem %s1915_s1, %s1391_s10  ;;  %v47_v5 = vld [vmem:[%s46_s12] sm:$0x1]  ;;  %s60_s19 = scalar_lea.vmem %s1916_s2, %s1393_s16 }
  0x17   :  { %v1392_v6 = vld [vmem:[%s49_s15] ss:$0 sm:$0xff]  ;;  %s63_s22 = scalar_lea.vmem %s1916_s2, %s1394_s17  ;;  %s73_s27 = scalar_lea.vmem %s1916_s2, %s1396_s23 }
  0x18   :  { %v58_v7 = vsel %vm57_vm1, %v47_v5, %v1392_v6  ;;  %v61_v9 = vld [vmem:[%s60_s19] sm:$0x1]  ;;  %s76_s30 = scalar_lea.vmem %s1916_s2, %s1397_s24  ;;  %s86_s3 = scalar_lea.vmem %s1916_s2, %s1399_s8 }
  0x19   :  { %1651 = vtanh.f32 %v58_v7  ;;  %v1395_v10 = vld [vmem:[%s63_s22] ss:$0 sm:$0xff]  ;;  %s89_s13 = scalar_lea.vmem %s1916_s2, %s1400_s9  ;;  %s1403_s15 = sld [smem:[#allocation2 + $0xc]] }
  0x1a   :  { %v71_v11 = vsel %vm57_vm1, %v61_v9, %v1395_v10  ;;  %v74_v16 = vld [vmem:[%s73_s27] sm:$0x1]  ;;  %s99_s18 = scalar_lea.vmem %s1916_s2, %s1402_s14  ;;  %s1406_s22 = sld [smem:[#allocation2 + $0xd]] }
  0x1b   :  { %v1398_v17 = vld [vmem:[%s76_s30] ss:$0 sm:$0xff]  ;;  %s112_s25 = scalar_lea.vmem %s1916_s2, %s1405_s21  ;;  %s1409_s30 = sld [smem:[#allocation2 + $0xe]] }
  0x1c   :  { %v84_v18 = vsel %vm57_vm1, %v74_v16, %v1398_v17  ;;  %v87_v23 = vld [vmem:[%s86_s3] sm:$0x1]  ;;  %s125_s0 = scalar_lea.vmem %s1916_s2, %s1408_s29  ;;  %s1412_s16 = sld [smem:[#allocation2 + $0xf]] }
  0x1d   :  { %v1401_v24 = vld [vmem:[%s89_s13] ss:$0 sm:$0xff]  ;;  %s138_s1 = scalar_lea.vmem %s1916_s2, %s1411_s5  ;;  %s1688_s24 = smov 16  }
  0x1e   :  { %v97_v25 = vsel %vm57_vm1, %v87_v23, %v1401_v24  ;;  %v100_v30 = vld [vmem:[%s99_s18] sm:$0x1]  ;;  %s1689_s26 = smov 4   ;;  %s1690_s27 = smov 12  }
  0x1f   :  { %s102_s20 = scalar_lea.vmem %s1916_s2, %s1403_s15  ;;  %v113_v37 = vld [vmem:[%s112_s25] sm:$0x1]  ;;  %s1693_s29 = smov 28  }
  0x20   :  { %v1404_v31 = vld [vmem:[%s102_s20] ss:$0 sm:$0xff]  ;;  %s115_s28 = scalar_lea.vmem %s1916_s2, %s1406_s22 }
  0x21   :  { %v110_v32 = vsel %vm57_vm1, %v100_v30, %v1404_v31  ;;  %v1407_v38 = vld [vmem:[%s115_s28] ss:$0 sm:$0xff]  ;;  %s128_s11 = scalar_lea.vmem %s1916_s2, %s1409_s30  ;;  %s1692_s28 = smov 24  }
  0x22   :  { %v123_v39 = vsel %vm57_vm1, %v113_v37, %v1407_v38  ;;  %v126_v44 = vld [vmem:[%s125_s0] sm:$0x1]  ;;  %s141_s21 = scalar_lea.vmem %s1916_s2, %s1412_s16  ;;  %s1687_s2 = smov 8  }
  0x23   :  { %v1652_v8 = vpop.eup %1651  ;;  %v1410_v45 = vld [vmem:[%s128_s11] ss:$0 sm:$0xff] }
  0x24   :  { %1485 = vmatmul.mubr.msk.f32.vlgmr.msra.gmra.mrb[0].mxu0 %vm151_vm2, %v1652_v8  ;;  %v136_v46 = vsel %vm57_vm1, %v126_v44, %v1410_v45  ;;  %v139_v54 = vld [vmem:[%s138_s1] sm:$0x1] }
  0x25   :  { %1600 = vmatpush3.bf16.msra.mxu0 %v1744_v3  ;;  %1498 = vmatprep.mubr.msk.f32.mxu0 %vm1685_vm0, %v1686_v4  ;;  %v1413_v55 = vld [vmem:[%s141_s21] ss:$0 sm:$0xff] }
  0x26   :  { %1604 = vmatprep.subr.bf16.mxu0 %v1684_v2  ;;  %v149_v56 = vsel %vm57_vm1, %v139_v54, %v1413_v55  ;;  %v1422_v8 = vld [vmem:[%s1918_s4] ss:$0 sm:$0xff]  ;;  %s1691_s4 = smov 20  }
  0xf7   :  { %v221_v12 = vpop.f32.mrb[0].mxu0 }
  0xf8   :  { %v225_v13 = vadd.f32 %v221_v12, %v71_v11  ;;  %v1486_v14 = vpop.f32.mrb[1].mxu0 }
  0xfa   :  { %1653 = vtanh.f32 %v225_v13 }
 0x104   :  { %v1774_v15 = vpop.eup %1653 }
 0x105   :  { %1492 = vmatmul.mubr.msk.f32.vlgmr.msra.gmra.mrb[0].mxu1 %vm151_vm2, %v1774_v15 }
 0x106   :  { %1603 = vmatpush3.bf16.msra.mxu1 %v1744_v3  ;;  %1505 = vmatprep.mubr.msk.f32.mxu1 %vm1685_vm0, %v1686_v4 }
 0x107   :  { %1607 = vmatprep.subr.bf16.mxu1 %v1684_v2 }
 0x1d8   :  { %v296_v19 = vpop.f32.mrb[0].mxu1 }
 0x1d9   :  { %v300_v20 = vadd.f32 %v296_v19, %v84_v18  ;;  %v1493_v21 = vpop.f32.mrb[1].mxu1 }
 0x1db   :  { %1655 = vtanh.f32 %v300_v20 }
 0x1e5   :  { %v1789_v22 = vpop.eup %1655 }
 0x1e6   :  { %1499 = vmatmul.mubr.msk.f32.vlgmr.msra.gmra.mrb[2].mxu0 %vm151_vm2, %v1789_v22 }
 0x1e7   :  { %1606 = vmatpush3.bf16.msra.mxu0 %v1744_v3  ;;  %1512 = vmatprep.mubr.msk.f32.mxu0 %vm1685_vm0, %v1686_v4 }
 0x1e8   :  { %1610 = vmatprep.subr.bf16.mxu0 %v1684_v2 }
 0x2b9   :  { %v371_v26 = vpop.f32.mrb[2].mxu0 }
 0x2ba   :  { %v375_v27 = vadd.f32 %v371_v26, %v97_v25  ;;  %v1500_v28 = vpop.f32.mrb[3].mxu0 }
 0x2bc   :  { %1657 = vtanh.f32 %v375_v27 }
 0x2c6   :  { %v1658_v29 = vpop.eup %1657 }
 0x2c7   :  { %1506 = vmatmul.mubr.msk.f32.vlgmr.msra.gmra.mrb[2].mxu1 %vm151_vm2, %v1658_v29 }
 0x2c8   :  { %1609 = vmatpush3.bf16.msra.mxu1 %v1744_v3  ;;  %1519 = vmatprep.mubr.msk.f32.mxu1 %vm1685_vm0, %v1686_v4 }
 0x2c9   :  { %1613 = vmatprep.subr.bf16.mxu1 %v1684_v2 }
 0x39a   :  { %v446_v33 = vpop.f32.mrb[2].mxu1 }
 0x39b   :  { %v450_v34 = vadd.f32 %v446_v33, %v110_v32  ;;  %v1507_v35 = vpop.f32.mrb[3].mxu1 }
 0x39d   :  { %1659 = vtanh.f32 %v450_v34 }
 0x3a7   :  { %v1816_v36 = vpop.eup %1659 }
 0x3a8   :  { %1513 = vmatmul.mubr.msk.f32.vlgmr.msra.gmra.mrb[4].mxu0 %vm151_vm2, %v1816_v36 }
 0x3a9   :  { %1612 = vmatpush3.bf16.msra.mxu0 %v1744_v3  ;;  %1526 = vmatprep.mubr.msk.f32.mxu0 %vm1685_vm0, %v1686_v4 }
 0x3aa   :  { %1616 = vmatprep.subr.bf16.mxu0 %v1684_v2 }
 0x47b   :  { %v521_v40 = vpop.f32.mrb[4].mxu0 }
 0x47c   :  { %v525_v41 = vadd.f32 %v521_v40, %v123_v39  ;;  %v1514_v42 = vpop.f32.mrb[5].mxu0 }
 0x47e   :  { %1661 = vtanh.f32 %v525_v41 }
 0x488   :  { %v1662_v43 = vpop.eup %1661 }
 0x489   :  { %1520 = vmatmul.mubr.msk.f32.vlgmr.msra.gmra.mrb[4].mxu1 %vm151_vm2, %v1662_v43 }
 0x48a   :  { %1615 = vmatpush3.bf16.msra.mxu1 %v1744_v3  ;;  %1533 = vmatprep.mubr.msk.f32.mxu1 %vm1685_vm0, %v1686_v4 }
 0x48b   :  { %1619 = vmatprep.subr.bf16.mxu1 %v1684_v2 }
 0x55c   :  { %v596_v47 = vpop.f32.mrb[4].mxu1 }
 0x55d   :  { %v600_v48 = vadd.f32 %v596_v47, %v136_v46  ;;  %v1521_v49 = vpop.f32.mrb[5].mxu1 }
 0x55f   :  { %1663 = vtanh.f32 %v600_v48 }
 0x569   :  { %v1664_v53 = vpop.eup %1663 }
 0x56a   :  { %1527 = vmatmul.mubr.msk.f32.vlgmr.msra.gmra.mrb[6].mxu0 %vm151_vm2, %v1664_v53 }
 0x56b   :  { %1618 = vmatpush3.bf16.msra.mxu0 %v1617_v52  ;;  %1540 = vmatprep.mubr.msk.f32.mxu0 %vm1685_vm0, %v1686_v4 }
 0x56c   :  { %1622 = vmatprep.subr.bf16.mxu0 %v1684_v2 }
 0x56e   :  { %1541 = vmatmul.mubr.msk.f32.vlgmr.msra.gmra.mrb[8].mxu0 %vm151_vm2, %v1774_v15 }
 0x56f   :  { %1624 = vmatpush3.bf16.msra.mxu0 %v1617_v52  ;;  %1554 = vmatprep.mubr.msk.f32.mxu0 %vm1685_vm0, %v1686_v4 }
 0x570   :  { %1628 = vmatprep.subr.bf16.mxu0 %v1684_v2 }
 0x572   :  { %1555 = vmatmul.mubr.msk.f32.vlgmr.msra.gmra.mrb[10].mxu0 %vm151_vm2, %v1658_v29 }
 0x573   :  { %1630 = vmatpush3.bf16.msra.mxu0 %v1617_v52  ;;  %1568 = vmatprep.mubr.msk.f32.mxu0 %vm1685_vm0, %v1686_v4 }
 0x574   :  { %1634 = vmatprep.subr.bf16.mxu0 %v1684_v2 }
 0x576   :  { %1569 = vmatmul.mubr.msk.f32.vlgmr.msra.gmra.mrb[12].mxu0 %vm151_vm2, %v1662_v43 }
 0x577   :  { %1636 = vmatpush3.bf16.msra.mxu0 %v1617_v52  ;;  %1582 = vmatprep.mubr.msk.f32.mxu0 %vm1685_vm0, %v1686_v4 }
 0x63d   :  { %v671_v57 = vpop.f32.mrb[6].mxu0 }
 0x63e   :  { %v675_v58 = vadd.f32 %v671_v57, %v149_v56  ;;  %v1528_v59 = vpop.f32.mrb[7].mxu0 }
 0x640   :  { %1665 = vtanh.f32 %v675_v58 }
 0x641   :  { %v1872_v60 = vpop.f32.mrb[8].mxu0 }
 0x642   :  { %v1542_v61 = vpop.f32.mrb[9].mxu0  ;;  %v831_v29 = vadd.f32 %v1877_v62, %v1872_v60 }
 0x645   :  { %v970_v63 = vpop.f32.mrb[10].mxu0 }
 0x646   :  { %v971_v0 = vadd.f32 %v1877_v62, %v970_v63  ;;  %v1556_v1 = vpop.f32.mrb[11].mxu0 }
 0x648   :  { %1332 = vrot.lane.b32.xlu0 %v971_v0, %s1687_s2 }
 0x649   :  { %v1110_v3 = vpop.f32.mrb[12].mxu0 }
 0x64a   :  { %v1666_v5 = vpop.eup %1665  ;;  %v1111_v6 = vadd.f32 %v1877_v62, %v1110_v3  ;;  %v1570_v7 = vpop.f32.mrb[13].mxu0 }
 0x64b   :  { %1534 = vmatmul.mubr.msk.f32.vlgmr.msra.gmra.mrb[6].mxu1 %vm151_vm2, %v1666_v5  ;;  %1583 = vmatmul.mubr.msk.f32.vlgmr.msra.gmra.mrb[14].mxu0 %vm151_vm2, %v1666_v5 }
 0x64c   :  { %1621 = vmatpush3.bf16.msra.mxu1 %v1617_v52  ;;  %1340 = vrot.lane.b32.xlu1 %v1111_v6, %s1688_s24 }
 0x64d   :  { %1547 = vmatprep.mubr.msk.f32.mxu1 %vm1685_vm0, %v1686_v4  ;;  %1625 = vmatprep.subr.bf16.mxu1 %v1684_v2 }
 0x64f   :  { %1548 = vmatmul.mubr.msk.f32.vlgmr.msra.gmra.mrb[8].mxu1 %vm151_vm2, %v1789_v22 }
 0x650   :  { %1627 = vmatpush3.bf16.msra.mxu1 %v1617_v52  ;;  %1561 = vmatprep.mubr.msk.f32.mxu1 %vm1685_vm0, %v1686_v4 }
 0x651   :  { %1631 = vmatprep.subr.bf16.mxu1 %v1684_v2 }
 0x653   :  { %1562 = vmatmul.mubr.msk.f32.vlgmr.msra.gmra.mrb[10].mxu1 %vm151_vm2, %v1816_v36 }
 0x654   :  { %1633 = vmatpush3.bf16.msra.mxu1 %v1617_v52  ;;  %1575 = vmatprep.mubr.msk.f32.mxu1 %vm1685_vm0, %v1686_v4 }
 0x655   :  { %1637 = vmatprep.subr.bf16.mxu1 %v1684_v2 }
 0x657   :  { %1576 = vmatmul.mubr.msk.f32.vlgmr.msra.gmra.mrb[12].mxu1 %vm151_vm2, %v1664_v53 }
 0x658   :  { %1639 = vmatpush3.bf16.msra.mxu1 %v1617_v52  ;;  %1589 = vmatprep.mubr.msk.f32.mxu1 %vm1685_vm0, %v1686_v4 }
 0x6ba   :  { %v1333_v26 = vpop.permute.xlu0 %1332 }
 0x6be   :  { %v1341_v27 = vpop.permute.xlu1 %1340 }
 0x71e   :  { %v746_v9 = vpop.f32.mrb[6].mxu1  ;;  %v1250_v10 = vpop.f32.mrb[14].mxu0 }
 0x71f   :  { %v756_v11 = vadd.f32 %v1422_v8, %v746_v9  ;;  %v1535_v12 = vpop.f32.mrb[7].mxu1  ;;  %v1584_v13 = vpop.f32.mrb[15].mxu0  ;;  %v1251_v20 = vadd.f32 %v1877_v62, %v1250_v10 }
 0x721   :  { %1667 = vtanh.f32 %v756_v11 }
 0x722   :  { %v900_v14 = vpop.f32.mrb[8].mxu1 }
 0x723   :  { %v901_v15 = vadd.f32 %v1877_v62, %v900_v14  ;;  %v1549_v2 = vpop.f32.mrb[9].mxu1 }
 0x725   :  { %1328 = vrot.lane.b32.xlu0 %v901_v15, %s1689_s26 }
 0x726   :  { %v1040_v16 = vpop.f32.mrb[10].mxu1 }
 0x727   :  { %v1041_v17 = vadd.f32 %v1877_v62, %v1040_v16  ;;  %v1563_v4 = vpop.f32.mrb[11].mxu1 }
 0x729   :  { %1336 = vrot.lane.b32.xlu1 %v1041_v17, %s1690_s27 }
 0x72a   :  { %v1180_v18 = vpop.f32.mrb[12].mxu1 }
 0x72b   :  { %v1668_v19 = vpop.eup %1667  ;;  %v1181_v21 = vadd.f32 %v1877_v62, %v1180_v18  ;;  %v1577_v22 = vpop.f32.mrb[13].mxu1 }
 0x72c   :  { %1590 = vmatmul.mubr.msk.f32.vlgmr.msra.gmra.mrb[14].mxu1 %vm151_vm2, %v1668_v19 }
 0x72d   :  { %1344 = vrot.lane.b32.xlu0 %v1181_v21, %s1691_s4  ;;  %1348 = vrot.lane.b32.xlu1 %v1251_v20, %s1692_s28 }
 0x797   :  { %v1329_v28 = vpop.permute.xlu0 %1328 }
 0x798   :  { %v1356_v30 = vsel %vm1355_vm3, %v831_v29, %v1329_v28 }
 0x799   :  { %v1358_v32 = vsel %vm1357_vm4, %v1356_v30, %v1333_v26 }
 0x79b   :  { %v1337_v31 = vpop.permute.xlu1 %1336 }
 0x79c   :  { %v1360_v33 = vsel %vm1359_vm5, %v1358_v32, %v1337_v31 }
 0x79d   :  { %v1361_v35 = vsel %vm151_vm2, %v1360_v33, %v1341_v27 }
 0x79f   :  { %v1345_v34 = vpop.permute.xlu0 %1344  ;;  %v1349_v37 = vpop.permute.xlu1 %1348 }
 0x7a0   :  { %v1363_v36 = vsel %vm1362_vm6, %v1361_v35, %v1345_v34 }
 0x7a1   :  { %v1365_v38 = vsel %vm1364_vm7, %v1363_v36, %v1349_v37 }
 0x7ff   :  { %v1323_v23 = vpop.f32.mrb[14].mxu1 }
 0x800   :  { %v1324_v24 = vadd.f32 %v1877_v62, %v1323_v23  ;;  %v1591_v25 = vpop.f32.mrb[15].mxu1 }
 0x802   :  { %1352 = vrot.lane.b32.xlu0 %v1324_v24, %s1693_s29 }
 0x874   :  { %v1353_v39 = vpop.permute.xlu0 %1352 }
 0x875   :  { %v1367_v40 = vsel %vm1366_vm8, %v1365_v38, %v1353_v39 }
 0x876   :  { %1369 = vst.msk [vmem:[%s1921_s7] sm:$0x3] %vm1368_vm9, %v1367_v40 }
 0x877   :  { %1374 = vsyncpa [#allocation3], 1 }

</bundles_post_ra>
